<compile_context>
chip_gen: v7x
topology: tpu7x:2x2x1
jax: 0.10.0
libtpu: 0.0.40
codegen_flags: <defaults>
</compile_context>

<pallas_src>
import jax
import jax.numpy as jnp
from jax.experimental import pallas as pl
from jax.experimental.pallas import tpu as pltpu


def _head_kernel(x_ref, w_ref, b_ref, o_ref):
    # x_ref: (1, Cin, THW)  w_ref: (Cout, Cin)  b_ref: (Cout, 1)
    # o_ref: (1, Cout, THW)
    x = x_ref[0]                                     # (Cin, THW)
    w = w_ref[...]                                   # (Cout, Cin)
    # Single fused MXU pass for box+cls heads, f32 accumulation.
    y = jax.lax.dot_general(
        w, x, (((1,), (0,)), ((), ())), preferred_element_type=jnp.float32
    )                                                # (Cout, THW) f32
    o_ref[0] = (y + b_ref[...].astype(jnp.float32)).astype(o_ref.dtype)


def fuse_head_params(w_box, b_box, w_cls, b_cls, dtype=None):
    """Init-time fusion of the two 1x1 convs (box rows first = torch.cat order).

    Accepts Conv2d-style (Cout, Cin, 1, 1) or already-squeezed (Cout, Cin)."""
    def _2d(w):
        return w[:, :, 0, 0] if w.ndim == 4 else w
    w = jnp.concatenate([_2d(w_box), _2d(w_cls)], axis=0)           # (Cout, Cin)
    b = jnp.concatenate([b_box, b_cls], axis=0)[:, None]            # (Cout, 1)
    if dtype is not None:
        w = w.astype(dtype)
        b = b.astype(dtype)
    return w, b


def _choose_tile_hw(hw, cin, cout, itemsize, vmem_budget):
    """Largest 128-multiple HW tile whose double-buffered in+out blocks fit."""
    hw128 = pl.cdiv(hw, 128) * 128
    per_lane = 2 * (cin + cout) * itemsize            # 2x (double-buffered) per lane column
    max_tile = max(128, (vmem_budget // per_lane) // 128 * 128)
    return int(min(hw128, max_tile))


def detection_head(x, w_fused, b_fused, *, out_dtype=None,
                   vmem_budget=40 * 2**20):
    """Pallas DetectionHead.forward: fused 1x1 box+cls convs, NCHW in/out."""
    B, C, H, W = x.shape
    Cout = w_fused.shape[0]
    HW = H * W
    out_dtype = out_dtype or x.dtype
    itemsize = max(jnp.dtype(x.dtype).itemsize, jnp.dtype(out_dtype).itemsize)

    tile_hw = _choose_tile_hw(HW, C, Cout, itemsize, vmem_budget)
    n_hw = pl.cdiv(HW, tile_hw)
    hw_pad = n_hw * tile_hw

    x_flat = x.reshape(B, C, HW)
    if hw_pad != HW:
        # Keep the lane axis 128-aligned so every output store is a full vst.
        x_flat = jnp.pad(x_flat, ((0, 0), (0, 0), (0, hw_pad - HW)))

    # Explicit scoped-VMEM limit: double-buffered in/out blocks + resident
    # weights/bias + headroom (default scoped limit is only 16/32 MiB).
    need = (2 * (C + Cout) * tile_hw * itemsize
            + Cout * (C + 1) * jnp.dtype(w_fused.dtype).itemsize
            + (2 << 20))
    vmem_limit = int(min(max(need, 32 << 20), 64 << 20))

    out = pl.pallas_call(
        _head_kernel,
        out_shape=jax.ShapeDtypeStruct((B, Cout, hw_pad), out_dtype),
        grid=(B, n_hw),
        in_specs=[
            pl.BlockSpec((1, C, tile_hw), lambda bi, hi: (bi, 0, hi)),  # per-(batch, HW-tile)
            pl.BlockSpec((Cout, C), lambda bi, hi: (0, 0)),             # fused weight (resident)
            pl.BlockSpec((Cout, 1), lambda bi, hi: (0, 0)),             # fused bias (resident)
        ],
        out_specs=pl.BlockSpec((1, Cout, tile_hw), lambda bi, hi: (bi, 0, hi)),
        compiler_params=pltpu.CompilerParams(
            dimension_semantics=("parallel", "parallel"),
            vmem_limit_bytes=vmem_limit,
        ),
    )(x_flat, w_fused, b_fused)

    if hw_pad != HW:
        out = out[:, :, :HW]
    return out.reshape(B, Cout, H, W)


def _reference(x, w_cls, b_cls, w_box, b_box):
    """Plain-JAX reference matching the torch module semantics."""
    cls = jnp.einsum("bchw,oc->bohw", x, w_cls) + b_cls[None, :, None, None]
    box = jnp.einsum("bchw,oc->bohw", x, w_box) + b_box[None, :, None, None]
    return jnp.concatenate([box, cls], axis=1)


if __name__ == "__main__":
    B, C, H, W = 2, 32, 16, 16
    NUM_CLASSES, ANCHORS = 80, 3
    CLS_OUT, BOX_OUT = ANCHORS * NUM_CLASSES, ANCHORS * 5   # 240, 15

    key = jax.random.PRNGKey(0)
    kx, k1, k2, k3, k4 = jax.random.split(key, 5)
    x = jax.random.normal(kx, (B, C, H, W), jnp.float32)

    # Deterministic synthetic Conv2d 1x1 parameters (weight (out, in), bias (out,)).
    wscale = 1.0 / (C ** 0.5)
    w_cls = jax.random.normal(k1, (CLS_OUT, C), jnp.float32) * wscale
    b_cls = jax.random.normal(k2, (CLS_OUT,), jnp.float32) * 0.02
    w_box = jax.random.normal(k3, (BOX_OUT, C), jnp.float32) * wscale
    b_box = jax.random.normal(k4, (BOX_OUT,), jnp.float32) * 0.02

    y_ref = _reference(x, w_cls, b_cls, w_box, b_box)

    # f32 activation path: exact-semantics check against the reference.
    w_f32, b_f32 = fuse_head_params(w_box, b_box, w_cls, b_cls)      # init-time fusion
    y = jax.block_until_ready(detection_head(x, w_f32, b_f32))
    assert y.shape == (B, BOX_OUT + CLS_OUT, H, W)
    assert jnp.allclose(y, y_ref, rtol=1e-4, atol=1e-4), "f32 mismatch vs reference"

    # bf16 activation path (halves HBM writeback on this writeback-bound head).
    w_bf, b_bf = fuse_head_params(w_box, b_box, w_cls, b_cls, dtype=jnp.bfloat16)
    y_bf = jax.block_until_ready(
        detection_head(x.astype(jnp.bfloat16), w_bf, b_bf))
    assert y_bf.dtype == jnp.bfloat16
    max_err = float(jnp.max(jnp.abs(y_bf.astype(jnp.float32) - y_ref)))
    assert max_err < 0.25, f"bf16 path error too large: {max_err}"

    print("KERNEL_OK")
</pallas_src>

<mosaic_0001>
module attributes {stable_mosaic.version = 11 : i64} {
  func.func @_head_kernel(%arg0: i32, %arg1: i32, %arg2: memref<1x32x256xf32, #tpu.memory_space<vmem>>, %arg3: memref<255x32xf32, #tpu.memory_space<vmem>>, %arg4: memref<255x1xf32, #tpu.memory_space<vmem>>, %arg5: memref<1x255x256xf32, #tpu.memory_space<vmem>>) attributes {dimension_semantics = [#tpu.dimension_semantics<parallel>, #tpu.dimension_semantics<parallel>], iteration_bounds = array<i64: 2, 1>, scalar_prefetch = 0 : i64, scratch_operands = 0 : i64, tpu.core_type = #tpu.core_type<tc>, window_params = [{transform_indices = @transform_0, window_bounds = array<i64: 1, 32, 256>}, {pipeline_mode = #tpu.pipeline_mode<synchronous>, transform_indices = @transform_1, window_bounds = array<i64: 255, 32>}, {pipeline_mode = #tpu.pipeline_mode<synchronous>, transform_indices = @transform_2, window_bounds = array<i64: 255, 1>}, {transform_indices = @transform_3, window_bounds = array<i64: 1, 255, 256>}]} {
    %c0 = arith.constant 0 : index
    %c0_0 = arith.constant 0 : index
    %c0_1 = arith.constant 0 : index
    %0 = vector.load %arg2[%c0, %c0_0, %c0_1] : memref<1x32x256xf32, #tpu.memory_space<vmem>>, vector<1x32x256xf32>
    %1 = vector.shape_cast %0 : vector<1x32x256xf32> to vector<32x256xf32>
    %c0_2 = arith.constant 0 : index
    %c0_3 = arith.constant 0 : index
    %2 = vector.load %arg3[%c0_2, %c0_3] : memref<255x32xf32, #tpu.memory_space<vmem>>, vector<255x32xf32>
    %cst = arith.constant dense<0.000000e+00> : vector<255x256xf32>
    %3 = tpu.matmul %2, %1, %cst {dimension_numbers = #tpu.dot_dimension_numbers<[1], [0], [0], [1], [0, 0, 1, 1], [], []>} : vector<255x32xf32>, vector<32x256xf32>, vector<255x256xf32> -> vector<255x256xf32>
    %c0_4 = arith.constant 0 : index
    %c0_5 = arith.constant 0 : index
    %4 = vector.load %arg4[%c0_4, %c0_5] : memref<255x1xf32, #tpu.memory_space<vmem>>, vector<255x1xf32>
    %5 = vector.broadcast %4 : vector<255x1xf32> to vector<255x256xf32>
    %6 = arith.addf %3, %5 : vector<255x256xf32>
    %c0_6 = arith.constant 0 : index
    %c0_7 = arith.constant 0 : index
    %c0_8 = arith.constant 0 : index
    %7 = vector.load %arg5[%c0_6, %c0_7, %c0_8] : memref<1x255x256xf32, #tpu.memory_space<vmem>>, vector<1x255x256xf32>
    %8 = vector.shape_cast %7 : vector<1x255x256xf32> to vector<255x256xf32>
    %9 = vector.shape_cast %6 : vector<255x256xf32> to vector<1x255x256xf32>
    tpu.vector_store %arg5[%c0_6, %c0_7, %c0_8], %9 {strides = array<i32>} : memref<1x255x256xf32, #tpu.memory_space<vmem>>, vector<1x255x256xf32>,
    return
  }
  func.func @transform_0(%arg0: i32, %arg1: i32) -> (i32, i32, i32) {
    %c0_i32 = arith.constant 0 : i32
    %c0_i32_0 = arith.constant 0 : i32
    return %arg0, %c0_i32, %arg1 : i32, i32, i32
  }
  func.func @transform_1(%arg0: i32, %arg1: i32) -> (i32, i32) {
    %c0_i32 = arith.constant 0 : i32
    %c0_i32_0 = arith.constant 0 : i32
    %c0_i32_1 = arith.constant 0 : i32
    return %c0_i32, %c0_i32_0 : i32, i32
  }
  func.func @transform_2(%arg0: i32, %arg1: i32) -> (i32, i32) {
    %c0_i32 = arith.constant 0 : i32
    %c0_i32_0 = arith.constant 0 : i32
    %c0_i32_1 = arith.constant 0 : i32
    return %c0_i32, %c0_i32_0 : i32, i32
  }
  func.func @transform_3(%arg0: i32, %arg1: i32) -> (i32, i32, i32) {
    %c0_i32 = arith.constant 0 : i32
    %c0_i32_0 = arith.constant 0 : i32
    return %arg0, %c0_i32, %arg1 : i32, i32, i32
  }
}

</mosaic_0001>

<bundles_post_ra>
// kernel: tpu_custom_call.1
= control target key start
LH: loop header
LB: loop body
LE: loop exit
PB: predicated region body
PF: predicated region fallthrough
CT: control target
= control target key end

     0   :  { %s1078_s12 = smov 0   ;;  %s1080_s13 = smov 0   ;;  %s1485_s0 = inlined_call_operand.vmem [shape: f32[2,32,256], index: 0, kind: input, shape index: {}]   ;;  %s1486_s1 = inlined_call_operand.vmem [shape: f32[255,32], index: 1, kind: input, shape index: {}]   ;;  %s1487_s2 = inlined_call_operand.vmem [shape: f32[255,1], index: 2, kind: input, shape index: {}]   ;;  %s1488_s3 = inlined_call_operand.vmem [shape: f32[2,255,256], index: 3, kind: output, shape index: {}]  }
   0x1   :  { %s1082_s14 = smov 0  }
   0x2 LB: > { %s25_s15 = sadd.s32 1, %s1050_s13  ;;  %p951_p0 = scmp.ge.s32.totalorder %s1054_s14, 1  ;;  %s1054_s14 = sphi %s1082_s14, %s13_s14   ;;  %s1050_s13 = sphi %s1080_s13, %s1490_s13   ;;  %s1046_s12 = sphi %s1078_s12, %s1489_s12  }
   0x3   : > { %p27_p1 = scmp.ge.s32.totalorder %s25_s15, 2  ;;  %p158_p2 = scmp.lt.s32.totalorder %s1054_s14, 3 }
   0x5   : > { %s1492_s15 = smov (%p27_p1, %s25_s15), 0  ;;  %p159_p3 = pnand %p951_p0, %p158_p2 }
   0x6   : > { %p191_p4 = scmp.lt.s32.totalorder (!%p159_p3), %s1046_s12, 1  ;;  %v1056_v0 = vmov (!%p159_p3), 0.0   ;;  %v1057_v1 = vmov (!%p159_p3), 0   ;;  %v252_v2 = vld [vmem:[%s1487_s2 + $0x10] sm:$0xff] (!%p159_p3)  ;;  %v250_v3 = vld [vmem:[%s1487_s2] sm:$0xff] (!%p159_p3)  ;;  %v253_v15 = vld [vmem:[%s1487_s2 + $0x18] sm:$0xff] (!%p159_p3) }
   0x7   : > { %162 = sbr.rel (%p159_p3) target bundleno = 304 (0x130), region = 32  ;;  %603 = vmatprep.mubr.f32.mxu0 (!%p159_p3), %v1056_v0  ;;  %699 = vmatprep.mubr.f32.mxu1 (!%p159_p3), %v1056_v0  ;;  %v251_v16 = vld [vmem:[%s1487_s2 + $0x8] sm:$0xff] (!%p159_p3)  ;;  %v254_v19 = vld [vmem:[%s1487_s2 + $0x20] sm:$0xff] (!%p159_p3)  ;;  %vm442_vm0 = vcmask (!%p159_p3), 261120   ;;  %v257_v22 = vld [vmem:[%s1487_s2 + $0x38] sm:$0xff] (!%p159_p3) }
   0x8   : > { %1031 = vset.pattern.permute.xlu1 (!%p159_p3), %v1057_v1  ;;  %1030 = vset.pattern.permute.xlu0 (!%p159_p3), %v1057_v1  ;;  %v255_v18 = vld [vmem:[%s1487_s2 + $0x28] sm:$0xff] (!%p159_p3)  ;;  %v218_v20 = vld [vmem:[%s1486_s1] sm:$0xff] (!%p159_p3)  ;;  %v256_v23 = vld [vmem:[%s1487_s2 + $0x30] sm:$0xff] (!%p159_p3) }
   0x9   : > { %294 = vperm.xlu1 (!%p159_p3), %1031, %v252_v2   ;;  %284 = vperm.xlu0 (!%p159_p3), %1030, %v250_v3   ;;  %v234_v21 = vld [vmem:[%s1486_s1 + $0x80] sm:$0xff] (!%p159_p3)  ;;  %v219_v24 = vld [vmem:[%s1486_s1 + $0x8] sm:$0xff] (!%p159_p3)  ;;  %v220_v28 = vld [vmem:[%s1486_s1 + $0x10] sm:$0xff] (!%p159_p3) }
   0xa   : > { %v235_v25 = vld [vmem:[%s1486_s1 + $0x88] sm:$0xff] (!%p159_p3)  ;;  %v258_v27 = vld [vmem:[%s1487_s2 + $0x40] sm:$0xff] (!%p159_p3)  ;;  %v236_v29 = vld [vmem:[%s1486_s1 + $0x90] sm:$0xff] (!%p159_p3) }
   0xb   : > { %v259_v26 = vld [vmem:[%s1487_s2 + $0x48] sm:$0xff] (!%p159_p3)  ;;  %v261_v30 = vld [vmem:[%s1487_s2 + $0x58] sm:$0xff] (!%p159_p3)  ;;  %v260_v31 = vld [vmem:[%s1487_s2 + $0x50] sm:$0xff] (!%p159_p3) }
   0xc   : > { %v221_v32 = vld [vmem:[%s1486_s1 + $0x18] sm:$0xff] (!%p159_p3)  ;;  %v263_v34 = vld [vmem:[%s1487_s2 + $0x68] sm:$0xff] (!%p159_p3)  ;;  %v262_v35 = vld [vmem:[%s1487_s2 + $0x60] sm:$0xff] (!%p159_p3) }
   0xd   : > { %299 = vperm.xlu1 (!%p159_p3), %1031, %v253_v15   ;;  %289 = vperm.xlu0 (!%p159_p3), %1030, %v251_v16   ;;  %v237_v33 = vld [vmem:[%s1486_s1 + $0x98] sm:$0xff] (!%p159_p3)  ;;  %v222_v36 = vld [vmem:[%s1486_s1 + $0x20] sm:$0xff] (!%p159_p3)  ;;  %v264_v39 = vld [vmem:[%s1487_s2 + $0x70] sm:$0xff] (!%p159_p3) }
   0xe   : > { %s1494_s12 = smov (!%p191_p4, %s1046_s12), 1  ;;  %v238_v37 = vld [vmem:[%s1486_s1 + $0xa0] sm:$0xff]  ;;  %v265_v38 = vld [vmem:[%s1487_s2 + $0x78] sm:$0xff]  ;;  %v223_v40 = vld [vmem:[%s1486_s1 + $0x28] sm:$0xff] }
   0xf   : > { %s990_s16 = sshll.u32 %s1494_s12, 6  ;;  %v239_v41 = vld [vmem:[%s1486_s1 + $0xa8] sm:$0xff]  ;;  %v266_v43 = vld [vmem:[%s1487_s2 + $0x80] sm:$0xff]  ;;  %v224_v44 = vld [vmem:[%s1486_s1 + $0x30] sm:$0xff]  ;;  %s991_s6 = sshll.u32 %s1494_s12, 9 }
  0x10   : > { %s198_s21 = scalar_lea.vmem %s1485_s0, %s990_s16  ;;  %v267_v42 = vld [vmem:[%s1487_s2 + $0x88] sm:$0xff]  ;;  %v240_v45 = vld [vmem:[%s1486_s1 + $0xb0] sm:$0xff]  ;;  %v269_v46 = vld [vmem:[%s1487_s2 + $0x98] sm:$0xff]  ;;  %s1386_s9 = scalar_lea.vmem %s1488_s3, %s991_s6 }
  0x11   : > { %v211_v4 = vld [vmem:[%s198_s21 + $0x8] sm:$0xff]  ;;  %v213_v5 = vld [vmem:[%s198_s21 + $0x18] sm:$0xff]  ;;  %v210_v6 = vld [vmem:[%s198_s21] sm:$0xff]  ;;  %309 = vperm.xlu1 %1031, %v255_v18   ;;  %304 = vperm.xlu0 %1030, %v254_v19  }
  0x12   : > { %v992_v7 = vpack.c.bf16 %v213_v5, %v211_v4  ;;  %v212_v8 = vld [vmem:[%s198_s21 + $0x10] sm:$0xff]  ;;  %v215_v9 = vld [vmem:[%s198_s21 + $0x28] sm:$0xff]  ;;  %v217_v10 = vld [vmem:[%s198_s21 + $0x38] sm:$0xff] }
  0x13   : > { %v994_v11 = vpack.c.bf16 %v212_v8, %v210_v6  ;;  %v996_v12 = vpack.c.bf16 %v217_v10, %v215_v9  ;;  %v214_v13 = vld [vmem:[%s198_s21 + $0x20] sm:$0xff]  ;;  %v216_v14 = vld [vmem:[%s198_s21 + $0x30] sm:$0xff]  ;;  %v225_v48 = vld [vmem:[%s1486_s1 + $0x38] sm:$0xff] }
  0x14   : > { %993 = vmatprep.subr.bf16.mxu0 %v992_v7  ;;  %1000 = vmatprep.subr.bf16.mxu1 %v992_v7  ;;  %v998_v17 = vpack.c.bf16 %v216_v14, %v214_v13  ;;  %v268_v47 = vld [vmem:[%s1487_s2 + $0x90] sm:$0xff]  ;;  %v241_v49 = vld [vmem:[%s1486_s1 + $0xb8] sm:$0xff]  ;;  %v271_v50 = vld [vmem:[%s1487_s2 + $0xa8] sm:$0xff] }
  0x15   : > { %995 = vmatpush1.bf16.msra.mxu0 %v994_v11  ;;  %1002 = vmatpush1.bf16.msra.mxu1 %v994_v11  ;;  %v270_v51 = vld [vmem:[%s1487_s2 + $0xa0] sm:$0xff]  ;;  %v273_v54 = vld [vmem:[%s1487_s2 + $0xb8] sm:$0xff]  ;;  %v272_v55 = vld [vmem:[%s1487_s2 + $0xb0] sm:$0xff] }
  0x16   : > { %997 = vmatprep.subr.bf16.mxu0 %v996_v12  ;;  %1001 = vmatprep.subr.bf16.mxu1 %v996_v12  ;;  %v226_v52 = vld [vmem:[%s1486_s1 + $0x40] sm:$0xff]  ;;  %v227_v56 = vld [vmem:[%s1486_s1 + $0x48] sm:$0xff]  ;;  %v228_v60 = vld [vmem:[%s1486_s1 + $0x50] sm:$0xff] }
  0x17   : > { %319 = vperm.xlu1 %1031, %v257_v22   ;;  %314 = vperm.xlu0 %1030, %v256_v23   ;;  %v242_v53 = vld [vmem:[%s1486_s1 + $0xc0] sm:$0xff]  ;;  %v243_v57 = vld [vmem:[%s1486_s1 + $0xc8] sm:$0xff]  ;;  %v244_v61 = vld [vmem:[%s1486_s1 + $0xd0] sm:$0xff] }
  0x18   : > { %v275_v58 = vld [vmem:[%s1487_s2 + $0xc8] sm:$0xff]  ;;  %v274_v59 = vld [vmem:[%s1487_s2 + $0xc0] sm:$0xff]  ;;  %v277_v62 = vld [vmem:[%s1487_s2 + $0xd8] sm:$0xff] }
  0x19   : > { %999 = vmatpush1.bf16.msra.mxu0 %v998_v17  ;;  %1003 = vmatpush1.bf16.msra.mxu1 %v998_v17  ;;  %v276_v63 = vld [vmem:[%s1487_s2 + $0xd0] sm:$0xff]  ;;  %v229_v1 = vld [vmem:[%s1486_s1 + $0x58] sm:$0xff]  ;;  %v279_v3 = vld [vmem:[%s1487_s2 + $0xe8] sm:$0xff] }
  0x1a   : > { %v245_v2 = vld [vmem:[%s1486_s1 + $0xd8] sm:$0xff]  ;;  %v278_v4 = vld [vmem:[%s1487_s2 + $0xe0] sm:$0xff]  ;;  %v280_v8 = vld [vmem:[%s1487_s2 + $0xf0] sm:$0xff] }
  0x1b   : > { %329 = vperm.xlu1 %1031, %v259_v26   ;;  %324 = vperm.xlu0 %1030, %v258_v27   ;;  %v230_v5 = vld [vmem:[%s1486_s1 + $0x60] sm:$0xff]  ;;  %v281_v7 = vld [vmem:[%s1487_s2 + $0xf8] sm:$0x7f]  ;;  %v231_v9 = vld [vmem:[%s1486_s1 + $0x68] sm:$0xff] }
  0x1c   : > { %956 = vmatmul.mubr.msk.f32.vlgmr.msra.gmra.mrb[0].mxu0 %vm442_vm0, %v218_v20  ;;  %972 = vmatmul.mubr.msk.f32.vlgmr.msra.gmra.mrb[0].mxu1 %vm442_vm0, %v234_v21  ;;  %v246_v6 = vld [vmem:[%s1486_s1 + $0xe0] sm:$0xff]  ;;  %v247_v10 = vld [vmem:[%s1486_s1 + $0xe8] sm:$0xff]  ;;  %v232_v11 = vld [vmem:[%s1486_s1 + $0x70] sm:$0xff] }
  0x1d   : > { %609 = vmatprep.mubr.f32.mxu0 %v1056_v0  ;;  %705 = vmatprep.mubr.f32.mxu1 %v1056_v0  ;;  %v248_v12 = vld [vmem:[%s1486_s1 + $0xf0] sm:$0xff]  ;;  %v233_v13 = vld [vmem:[%s1486_s1 + $0x78] sm:$0xff] }
  0x1e   : > { %v249_v14 = vld [vmem:[%s1486_s1 + $0xf8] sm:$0x7f] }
  0x1f   : > { %339 = vperm.xlu1 %1031, %v261_v30   ;;  %334 = vperm.xlu0 %1030, %v260_v31  }
  0x20   : > { %957 = vmatmul.mubr.msk.f32.gmra.mrb[2].mxu0 %vm442_vm0, %v219_v24  ;;  %973 = vmatmul.mubr.msk.f32.gmra.mrb[2].mxu1 %vm442_vm0, %v235_v25 }
  0x21   : > { %615 = vmatprep.mubr.f32.mxu0 %v1056_v0  ;;  %711 = vmatprep.mubr.f32.mxu1 %v1056_v0 }
  0x23   : > { %349 = vperm.xlu1 %1031, %v263_v34   ;;  %344 = vperm.xlu0 %1030, %v262_v35  }
  0x24   : > { %958 = vmatmul.mubr.msk.f32.gmra.mrb[4].mxu0 %vm442_vm0, %v220_v28  ;;  %974 = vmatmul.mubr.msk.f32.gmra.mrb[4].mxu1 %vm442_vm0, %v236_v29 }
  0x25   : > { %621 = vmatprep.mubr.f32.mxu0 %v1056_v0  ;;  %717 = vmatprep.mubr.f32.mxu1 %v1056_v0 }
  0x27   : > { %359 = vperm.xlu1 %1031, %v265_v38   ;;  %354 = vperm.xlu0 %1030, %v264_v39  }
  0x28   : > { %959 = vmatmul.mubr.msk.f32.gmra.mrb[6].mxu0 %vm442_vm0, %v221_v32  ;;  %975 = vmatmul.mubr.msk.f32.gmra.mrb[6].mxu1 %vm442_vm0, %v237_v33 }
  0x29   : > { %627 = vmatprep.mubr.f32.mxu0 %v1056_v0  ;;  %723 = vmatprep.mubr.f32.mxu1 %v1056_v0 }
  0x2b   : > { %369 = vperm.xlu1 %1031, %v267_v42   ;;  %364 = vperm.xlu0 %1030, %v266_v43  }
  0x2c   : > { %960 = vmatmul.mubr.msk.f32.gmra.mrb[8].mxu0 %vm442_vm0, %v222_v36  ;;  %976 = vmatmul.mubr.msk.f32.gmra.mrb[8].mxu1 %vm442_vm0, %v238_v37 }
  0x2d   : > { %633 = vmatprep.mubr.f32.mxu0 %v1056_v0  ;;  %729 = vmatprep.mubr.f32.mxu1 %v1056_v0 }
  0x2f   : > { %379 = vperm.xlu1 %1031, %v269_v46   ;;  %374 = vperm.xlu0 %1030, %v268_v47  }
  0x30   : > { %961 = vmatmul.mubr.msk.f32.gmra.mrb[10].mxu0 %vm442_vm0, %v223_v40  ;;  %977 = vmatmul.mubr.msk.f32.gmra.mrb[10].mxu1 %vm442_vm0, %v239_v41 }
  0x31   : > { %639 = vmatprep.mubr.f32.mxu0 %v1056_v0  ;;  %735 = vmatprep.mubr.f32.mxu1 %v1056_v0 }
  0x33   : > { %389 = vperm.xlu1 %1031, %v271_v50   ;;  %384 = vperm.xlu0 %1030, %v270_v51  }
  0x34   : > { %962 = vmatmul.mubr.msk.f32.gmra.mrb[12].mxu0 %vm442_vm0, %v224_v44  ;;  %978 = vmatmul.mubr.msk.f32.gmra.mrb[12].mxu1 %vm442_vm0, %v240_v45 }
  0x35   : > { %645 = vmatprep.mubr.f32.mxu0 %v1056_v0  ;;  %741 = vmatprep.mubr.f32.mxu1 %v1056_v0 }
  0x37   : > { %399 = vperm.xlu1 %1031, %v273_v54   ;;  %394 = vperm.xlu0 %1030, %v272_v55  }
  0x38   : > { %963 = vmatmul.mubr.msk.f32.gmra.mrb[14].mxu0 %vm442_vm0, %v225_v48  ;;  %979 = vmatmul.mubr.msk.f32.gmra.mrb[14].mxu1 %vm442_vm0, %v241_v49 }
  0x39   : > { %651 = vmatprep.mubr.f32.mxu0 %v1056_v0  ;;  %747 = vmatprep.mubr.f32.mxu1 %v1056_v0 }
  0x3b   : > { %409 = vperm.xlu1 %1031, %v275_v58   ;;  %404 = vperm.xlu0 %1030, %v274_v59  }
  0x3c   : > { %964 = vmatmul.mubr.msk.f32.gmra.mrb[16].mxu0 %vm442_vm0, %v226_v52  ;;  %980 = vmatmul.mubr.msk.f32.gmra.mrb[16].mxu1 %vm442_vm0, %v242_v53 }
  0x3d   : > { %657 = vmatprep.mubr.f32.mxu0 %v1056_v0  ;;  %753 = vmatprep.mubr.f32.mxu1 %v1056_v0 }
  0x3f   : > { %419 = vperm.xlu1 %1031, %v277_v62   ;;  %414 = vperm.xlu0 %1030, %v276_v63  }
  0x40   : > { %965 = vmatmul.mubr.msk.f32.gmra.mrb[18].mxu0 %vm442_vm0, %v227_v56  ;;  %981 = vmatmul.mubr.msk.f32.gmra.mrb[18].mxu1 %vm442_vm0, %v243_v57 }
  0x41   : > { %663 = vmatprep.mubr.f32.mxu0 %v1056_v0  ;;  %759 = vmatprep.mubr.f32.mxu1 %v1056_v0 }
  0x43   : > { %429 = vperm.xlu1 %1031, %v279_v3   ;;  %424 = vperm.xlu0 %1030, %v278_v4  }
  0x44   : > { %966 = vmatmul.mubr.msk.f32.gmra.mrb[20].mxu0 %vm442_vm0, %v228_v60  ;;  %982 = vmatmul.mubr.msk.f32.gmra.mrb[20].mxu1 %vm442_vm0, %v244_v61 }
  0x45   : > { %669 = vmatprep.mubr.f32.mxu0 %v1056_v0  ;;  %765 = vmatprep.mubr.f32.mxu1 %v1056_v0 }
  0x47   : > { %439 = vperm.xlu1 %1031, %v281_v7   ;;  %434 = vperm.xlu0 %1030, %v280_v8  }
  0x48   : > { %967 = vmatmul.mubr.msk.f32.gmra.mrb[22].mxu0 %vm442_vm0, %v229_v1  ;;  %983 = vmatmul.mubr.msk.f32.gmra.mrb[22].mxu1 %vm442_vm0, %v245_v2 }
  0x49   : > { %675 = vmatprep.mubr.f32.mxu0 %v1056_v0  ;;  %771 = vmatprep.mubr.f32.mxu1 %v1056_v0 }
  0x4c   : > { %968 = vmatmul.mubr.msk.f32.gmra.mrb[24].mxu0 %vm442_vm0, %v230_v5  ;;  %984 = vmatmul.mubr.msk.f32.gmra.mrb[24].mxu1 %vm442_vm0, %v246_v6 }
  0x4d   : > { %681 = vmatprep.mubr.f32.mxu0 %v1056_v0  ;;  %777 = vmatprep.mubr.f32.mxu1 %v1056_v0 }
  0x50   : > { %969 = vmatmul.mubr.msk.f32.gmra.mrb[26].mxu0 %vm442_vm0, %v231_v9  ;;  %985 = vmatmul.mubr.msk.f32.gmra.mrb[26].mxu1 %vm442_vm0, %v247_v10 }
  0x51   : > { %687 = vmatprep.mubr.f32.mxu0 %v1056_v0  ;;  %783 = vmatprep.mubr.f32.mxu1 %v1056_v0 }
  0x54   : > { %970 = vmatmul.mubr.msk.f32.gmra.mrb[28].mxu0 %vm442_vm0, %v232_v11  ;;  %986 = vmatmul.mubr.msk.f32.gmra.mrb[28].mxu1 %vm442_vm0, %v248_v12 }
  0x55   : > { %693 = vmatprep.mubr.f32.mxu0 %v1056_v0  ;;  %789 = vmatprep.mubr.f32.mxu1 %v1056_v0 }
  0x58   : > { %971 = vmatmul.mubr.msk.f32.gmra.mrb[30].mxu0 %vm442_vm0, %v233_v13  ;;  %987 = vmatmul.mubr.msk.f32.gmra.mrb[30].mxu1 %vm442_vm0, %v249_v14 }
  0x88   : > { %v285_v15 = vpop.permute.xlu0 %284  ;;  %v295_v16 = vpop.permute.xlu1 %294 }
  0x8c   : > { %v290_v17 = vpop.permute.xlu0 %289  ;;  %v300_v18 = vpop.permute.xlu1 %299 }
  0x90   : > { %v1358_v19 = vpop.permute.xlu0 %304  ;;  %v1360_v0 = vpop.permute.xlu1 %309 }
  0x96   : > { %v1362_v20 = vpop.permute.xlu0 %314  ;;  %v1364_v21 = vpop.permute.xlu1 %319 }
  0x9a   : > { %v1366_v22 = vpop.permute.xlu0 %324  ;;  %v1368_v23 = vpop.permute.xlu1 %329 }
  0x9e   : > { %v1370_v24 = vpop.permute.xlu0 %334  ;;  %v1372_v25 = vpop.permute.xlu1 %339 }
  0xa2   : > { %v1374_v26 = vpop.permute.xlu0 %344  ;;  %v1376_v27 = vpop.permute.xlu1 %349 }
  0xa6   : > { %v1378_v28 = vpop.permute.xlu0 %354  ;;  %v1380_v29 = vpop.permute.xlu1 %359 }
  0xaa   : > { %v365_v30 = vpop.permute.xlu0 %364  ;;  %v370_v39 = vpop.permute.xlu1 %369 }
  0xae   : > { %v375_v48 = vpop.permute.xlu0 %374  ;;  %v380_v57 = vpop.permute.xlu1 %379 }
  0xb2   : > { %v385_v3 = vpop.permute.xlu0 %384  ;;  %v390_v12 = vpop.permute.xlu1 %389 }
  0xef   : > { %v605_v31 = vpop.f32.mrb[0].mxu0  ;;  %v701_v32 = vpop.f32.mrb[0].mxu1 }
  0xf0   : > { %v606_v33 = vadd.f32 %v605_v31, %v285_v15  ;;  %v702_v34 = vadd.f32 %v701_v32, %v365_v30  ;;  %v607_v35 = vpop.f32.mrb[1].mxu0  ;;  %v703_v36 = vpop.f32.mrb[1].mxu1 }
  0xf1   : > { %v608_v37 = vadd.f32 %v607_v35, %v285_v15  ;;  %v704_v38 = vadd.f32 %v703_v36, %v365_v30  ;;  %v395_v31 = vpop.permute.xlu0 %394 }
  0xf2   : > { %796 = vst [vmem:[%s1386_s9] sm:$0xff] %v606_v33  ;;  %828 = vst [vmem:[%s1386_s9 + $0x100] sm:$0xff] %v702_v34 }
  0xf3   : > { %797 = vst [vmem:[%s1386_s9 + $0x8] sm:$0xff] %v608_v37  ;;  %829 = vst [vmem:[%s1386_s9 + $0x108] sm:$0xff] %v704_v38  ;;  %v611_v40 = vpop.f32.mrb[2].mxu0  ;;  %v707_v41 = vpop.f32.mrb[2].mxu1 }
  0xf4   : > { %v612_v42 = vadd.f32 %v611_v40, %v290_v17  ;;  %v708_v43 = vadd.f32 %v707_v41, %v370_v39  ;;  %v613_v44 = vpop.f32.mrb[3].mxu0  ;;  %v709_v45 = vpop.f32.mrb[3].mxu1 }
  0xf5   : > { %v614_v46 = vadd.f32 %v613_v44, %v290_v17  ;;  %v710_v47 = vadd.f32 %v709_v45, %v370_v39  ;;  %v400_v39 = vpop.permute.xlu1 %399 }
  0xf6   : > { %798 = vst [vmem:[%s1386_s9 + $0x10] sm:$0xff] %v612_v42  ;;  %830 = vst [vmem:[%s1386_s9 + $0x110] sm:$0xff] %v708_v43 }
  0xf7   : > { %799 = vst [vmem:[%s1386_s9 + $0x18] sm:$0xff] %v614_v46  ;;  %831 = vst [vmem:[%s1386_s9 + $0x118] sm:$0xff] %v710_v47  ;;  %v617_v49 = vpop.f32.mrb[4].mxu0  ;;  %v713_v50 = vpop.f32.mrb[4].mxu1 }
  0xf8   : > { %v618_v51 = vadd.f32 %v617_v49, %v295_v16  ;;  %v714_v52 = vadd.f32 %v713_v50, %v375_v48  ;;  %v619_v53 = vpop.f32.mrb[5].mxu0  ;;  %v715_v54 = vpop.f32.mrb[5].mxu1 }
  0xf9   : > { %v620_v55 = vadd.f32 %v619_v53, %v295_v16  ;;  %v716_v56 = vadd.f32 %v715_v54, %v375_v48  ;;  %v405_v47 = vpop.permute.xlu0 %404 }
  0xfa   : > { %800 = vst [vmem:[%s1386_s9 + $0x20] sm:$0xff] %v618_v51  ;;  %832 = vst [vmem:[%s1386_s9 + $0x120] sm:$0xff] %v714_v52 }
  0xfb   : > { %801 = vst [vmem:[%s1386_s9 + $0x28] sm:$0xff] %v620_v55  ;;  %833 = vst [vmem:[%s1386_s9 + $0x128] sm:$0xff] %v716_v56  ;;  %v623_v58 = vpop.f32.mrb[6].mxu0  ;;  %v719_v59 = vpop.f32.mrb[6].mxu1 }
  0xfc   : > { %v624_v60 = vadd.f32 %v623_v58, %v300_v18  ;;  %v720_v61 = vadd.f32 %v719_v59, %v380_v57  ;;  %v625_v62 = vpop.f32.mrb[7].mxu0  ;;  %v721_v63 = vpop.f32.mrb[7].mxu1 }
  0xfd   : > { %v626_v1 = vadd.f32 %v625_v62, %v300_v18  ;;  %v722_v2 = vadd.f32 %v721_v63, %v380_v57  ;;  %v410_v55 = vpop.permute.xlu1 %409  ;;  %v415_v63 = vpop.permute.xlu0 %414 }
  0xfe   : > { %802 = vst [vmem:[%s1386_s9 + $0x30] sm:$0xff] %v624_v60  ;;  %834 = vst [vmem:[%s1386_s9 + $0x130] sm:$0xff] %v720_v61 }
  0xff   : > { %803 = vst [vmem:[%s1386_s9 + $0x38] sm:$0xff] %v626_v1  ;;  %835 = vst [vmem:[%s1386_s9 + $0x138] sm:$0xff] %v722_v2  ;;  %v629_v4 = vpop.f32.mrb[8].mxu0  ;;  %v725_v5 = vpop.f32.mrb[8].mxu1 }
 0x100   : > { %v630_v6 = vadd.f32 %v629_v4, %v1358_v19  ;;  %v726_v7 = vadd.f32 %v725_v5, %v385_v3  ;;  %v631_v8 = vpop.f32.mrb[9].mxu0  ;;  %v727_v9 = vpop.f32.mrb[9].mxu1 }
 0x101   : > { %v632_v10 = vadd.f32 %v631_v8, %v1358_v19  ;;  %v728_v11 = vadd.f32 %v727_v9, %v385_v3  ;;  %v420_v8 = vpop.permute.xlu1 %419 }
 0x102   : > { %804 = vst [vmem:[%s1386_s9 + $0x40] sm:$0xff] %v630_v6  ;;  %836 = vst [vmem:[%s1386_s9 + $0x140] sm:$0xff] %v726_v7 }
 0x103   : > { %805 = vst [vmem:[%s1386_s9 + $0x48] sm:$0xff] %v632_v10  ;;  %837 = vst [vmem:[%s1386_s9 + $0x148] sm:$0xff] %v728_v11  ;;  %v635_v13 = vpop.f32.mrb[10].mxu0  ;;  %v731_v14 = vpop.f32.mrb[10].mxu1 }
 0x104   : > { %v636_v15 = vadd.f32 %v635_v13, %v1360_v0  ;;  %v732_v16 = vadd.f32 %v731_v14, %v390_v12  ;;  %v637_v17 = vpop.f32.mrb[11].mxu0  ;;  %v733_v18 = vpop.f32.mrb[11].mxu1 }
 0x105   : > { %v638_v30 = vadd.f32 %v637_v17, %v1360_v0  ;;  %v734_v19 = vadd.f32 %v733_v18, %v390_v12 }
 0x106   : > { %806 = vst [vmem:[%s1386_s9 + $0x50] sm:$0xff] %v636_v15  ;;  %838 = vst [vmem:[%s1386_s9 + $0x150] sm:$0xff] %v732_v16  ;;  %v425_v16 = vpop.permute.xlu0 %424 }
 0x107   : > { %807 = vst [vmem:[%s1386_s9 + $0x58] sm:$0xff] %v638_v30  ;;  %839 = vst [vmem:[%s1386_s9 + $0x158] sm:$0xff] %v734_v19  ;;  %v641_v32 = vpop.f32.mrb[12].mxu0  ;;  %v737_v33 = vpop.f32.mrb[12].mxu1 }
 0x108   : > { %v642_v34 = vadd.f32 %v641_v32, %v1362_v20  ;;  %v738_v35 = vadd.f32 %v737_v33, %v395_v31  ;;  %v643_v36 = vpop.f32.mrb[13].mxu0  ;;  %v739_v37 = vpop.f32.mrb[13].mxu1 }
 0x109   : > { %v644_v38 = vadd.f32 %v643_v36, %v1362_v20  ;;  %v740_v0 = vadd.f32 %v739_v37, %v395_v31 }
 0x10a   : > { %808 = vst [vmem:[%s1386_s9 + $0x60] sm:$0xff] %v642_v34  ;;  %840 = vst [vmem:[%s1386_s9 + $0x160] sm:$0xff] %v738_v35  ;;  %v430_v34 = vpop.permute.xlu1 %429 }
 0x10b   : > { %809 = vst [vmem:[%s1386_s9 + $0x68] sm:$0xff] %v644_v38  ;;  %841 = vst [vmem:[%s1386_s9 + $0x168] sm:$0xff] %v740_v0  ;;  %v647_v40 = vpop.f32.mrb[14].mxu0  ;;  %v743_v41 = vpop.f32.mrb[14].mxu1 }
 0x10c   : > { %v648_v42 = vadd.f32 %v647_v40, %v1364_v21  ;;  %v744_v43 = vadd.f32 %v743_v41, %v400_v39  ;;  %v649_v44 = vpop.f32.mrb[15].mxu0  ;;  %v745_v45 = vpop.f32.mrb[15].mxu1 }
 0x10d   : > { %v650_v46 = vadd.f32 %v649_v44, %v1364_v21  ;;  %v746_v20 = vadd.f32 %v745_v45, %v400_v39  ;;  %v435_v41 = vpop.permute.xlu0 %434 }
 0x10e   : > { %810 = vst [vmem:[%s1386_s9 + $0x70] sm:$0xff] %v648_v42  ;;  %842 = vst [vmem:[%s1386_s9 + $0x170] sm:$0xff] %v744_v43 }
 0x10f   : > { %811 = vst [vmem:[%s1386_s9 + $0x78] sm:$0xff] %v650_v46  ;;  %843 = vst [vmem:[%s1386_s9 + $0x178] sm:$0xff] %v746_v20  ;;  %v653_v48 = vpop.f32.mrb[16].mxu0  ;;  %v749_v49 = vpop.f32.mrb[16].mxu1 }
 0x110   : > { %v654_v50 = vadd.f32 %v653_v48, %v1366_v22  ;;  %v750_v51 = vadd.f32 %v749_v49, %v405_v47  ;;  %v655_v52 = vpop.f32.mrb[17].mxu0  ;;  %v751_v53 = vpop.f32.mrb[17].mxu1 }
 0x111   : > { %v656_v54 = vadd.f32 %v655_v52, %v1366_v22  ;;  %v752_v21 = vadd.f32 %v751_v53, %v405_v47  ;;  %v440_v48 = vpop.permute.xlu1 %439 }
 0x112   : > { %812 = vst [vmem:[%s1386_s9 + $0x80] sm:$0xff] %v654_v50  ;;  %844 = vst [vmem:[%s1386_s9 + $0x180] sm:$0xff] %v750_v51 }
 0x113   : > { %813 = vst [vmem:[%s1386_s9 + $0x88] sm:$0xff] %v656_v54  ;;  %845 = vst [vmem:[%s1386_s9 + $0x188] sm:$0xff] %v752_v21  ;;  %v659_v56 = vpop.f32.mrb[18].mxu0  ;;  %v755_v57 = vpop.f32.mrb[18].mxu1 }
 0x114   : > { %v660_v58 = vadd.f32 %v659_v56, %v1368_v23  ;;  %v756_v59 = vadd.f32 %v755_v57, %v410_v55  ;;  %v661_v60 = vpop.f32.mrb[19].mxu0  ;;  %v757_v61 = vpop.f32.mrb[19].mxu1 }
 0x115   : > { %v662_v62 = vadd.f32 %v661_v60, %v1368_v23  ;;  %v758_v22 = vadd.f32 %v757_v61, %v410_v55 }
 0x116   : > { %814 = vst [vmem:[%s1386_s9 + $0x90] sm:$0xff] %v660_v58  ;;  %846 = vst [vmem:[%s1386_s9 + $0x190] sm:$0xff] %v756_v59 }
 0x117   : > { %815 = vst [vmem:[%s1386_s9 + $0x98] sm:$0xff] %v662_v62  ;;  %847 = vst [vmem:[%s1386_s9 + $0x198] sm:$0xff] %v758_v22  ;;  %v665_v1 = vpop.f32.mrb[20].mxu0  ;;  %v761_v2 = vpop.f32.mrb[20].mxu1 }
 0x118   : > { %v666_v3 = vadd.f32 %v665_v1, %v1370_v24  ;;  %v762_v4 = vadd.f32 %v761_v2, %v415_v63  ;;  %v667_v5 = vpop.f32.mrb[21].mxu0  ;;  %v763_v6 = vpop.f32.mrb[21].mxu1 }
 0x119   : > { %v668_v7 = vadd.f32 %v667_v5, %v1370_v24  ;;  %v764_v23 = vadd.f32 %v763_v6, %v415_v63 }
 0x11a   : > { %816 = vst [vmem:[%s1386_s9 + $0xa0] sm:$0xff] %v666_v3  ;;  %848 = vst [vmem:[%s1386_s9 + $0x1a0] sm:$0xff] %v762_v4 }
 0x11b   : > { %817 = vst [vmem:[%s1386_s9 + $0xa8] sm:$0xff] %v668_v7  ;;  %849 = vst [vmem:[%s1386_s9 + $0x1a8] sm:$0xff] %v764_v23  ;;  %v671_v9 = vpop.f32.mrb[22].mxu0  ;;  %v767_v10 = vpop.f32.mrb[22].mxu1 }
 0x11c   : > { %v672_v11 = vadd.f32 %v671_v9, %v1372_v25  ;;  %v768_v12 = vadd.f32 %v767_v10, %v420_v8  ;;  %v673_v13 = vpop.f32.mrb[23].mxu0  ;;  %v769_v14 = vpop.f32.mrb[23].mxu1 }
 0x11d   : > { %v674_v15 = vadd.f32 %v673_v13, %v1372_v25  ;;  %v770_v24 = vadd.f32 %v769_v14, %v420_v8 }
 0x11e   : > { %818 = vst [vmem:[%s1386_s9 + $0xb0] sm:$0xff] %v672_v11  ;;  %850 = vst [vmem:[%s1386_s9 + $0x1b0] sm:$0xff] %v768_v12 }
 0x11f   : > { %819 = vst [vmem:[%s1386_s9 + $0xb8] sm:$0xff] %v674_v15  ;;  %851 = vst [vmem:[%s1386_s9 + $0x1b8] sm:$0xff] %v770_v24  ;;  %v677_v17 = vpop.f32.mrb[24].mxu0  ;;  %v773_v18 = vpop.f32.mrb[24].mxu1 }
 0x120   : > { %v678_v30 = vadd.f32 %v677_v17, %v1374_v26  ;;  %v774_v19 = vadd.f32 %v773_v18, %v425_v16  ;;  %v679_v31 = vpop.f32.mrb[25].mxu0  ;;  %v775_v32 = vpop.f32.mrb[25].mxu1 }
 0x121   : > { %v680_v33 = vadd.f32 %v679_v31, %v1374_v26  ;;  %v776_v25 = vadd.f32 %v775_v32, %v425_v16 }
 0x122   : > { %820 = vst [vmem:[%s1386_s9 + $0xc0] sm:$0xff] %v678_v30  ;;  %852 = vst [vmem:[%s1386_s9 + $0x1c0] sm:$0xff] %v774_v19 }
 0x123   : > { %821 = vst [vmem:[%s1386_s9 + $0xc8] sm:$0xff] %v680_v33  ;;  %853 = vst [vmem:[%s1386_s9 + $0x1c8] sm:$0xff] %v776_v25  ;;  %v683_v35 = vpop.f32.mrb[26].mxu0  ;;  %v779_v36 = vpop.f32.mrb[26].mxu1 }
 0x124   : > { %v684_v37 = vadd.f32 %v683_v35, %v1376_v27  ;;  %v780_v38 = vadd.f32 %v779_v36, %v430_v34  ;;  %v685_v0 = vpop.f32.mrb[27].mxu0  ;;  %v781_v39 = vpop.f32.mrb[27].mxu1 }
 0x125   : > { %v686_v40 = vadd.f32 %v685_v0, %v1376_v27  ;;  %v782_v26 = vadd.f32 %v781_v39, %v430_v34 }
 0x126   : > { %822 = vst [vmem:[%s1386_s9 + $0xd0] sm:$0xff] %v684_v37  ;;  %854 = vst [vmem:[%s1386_s9 + $0x1d0] sm:$0xff] %v780_v38 }
 0x127   : > { %823 = vst [vmem:[%s1386_s9 + $0xd8] sm:$0xff] %v686_v40  ;;  %855 = vst [vmem:[%s1386_s9 + $0x1d8] sm:$0xff] %v782_v26  ;;  %v689_v42 = vpop.f32.mrb[28].mxu0  ;;  %v785_v43 = vpop.f32.mrb[28].mxu1 }
 0x128   : > { %v690_v44 = vadd.f32 %v689_v42, %v1378_v28  ;;  %v786_v45 = vadd.f32 %v785_v43, %v435_v41  ;;  %v691_v46 = vpop.f32.mrb[29].mxu0  ;;  %v787_v20 = vpop.f32.mrb[29].mxu1 }
 0x129   : > { %v692_v27 = vadd.f32 %v691_v46, %v1378_v28  ;;  %v788_v47 = vadd.f32 %v787_v20, %v435_v41 }
 0x12a   : > { %824 = vst [vmem:[%s1386_s9 + $0xe0] sm:$0xff] %v690_v44  ;;  %856 = vst [vmem:[%s1386_s9 + $0x1e0] sm:$0xff] %v786_v45 }
 0x12b   : > { %825 = vst [vmem:[%s1386_s9 + $0xe8] sm:$0xff] %v692_v27  ;;  %857 = vst [vmem:[%s1386_s9 + $0x1e8] sm:$0xff] %v788_v47  ;;  %v695_v49 = vpop.f32.mrb[30].mxu0  ;;  %v791_v50 = vpop.f32.mrb[30].mxu1 }
 0x12c   : > { %v696_v51 = vadd.f32 %v695_v49, %v1380_v29  ;;  %v792_v52 = vadd.f32 %v791_v50, %v440_v48  ;;  %v697_v53 = vpop.f32.mrb[31].mxu0  ;;  %v793_v54 = vpop.f32.mrb[31].mxu1 }
 0x12d   : > { %v698_v21 = vadd.f32 %v697_v53, %v1380_v29  ;;  %v794_v55 = vadd.f32 %v793_v54, %v440_v48 }
 0x12e   : > { %826 = vst [vmem:[%s1386_s9 + $0xf0] sm:$0xff] %v696_v51  ;;  %858 = vst [vmem:[%s1386_s9 + $0x1f0] sm:$0x7f] %v792_v52 }
 0x12f   : > { %827 = vst [vmem:[%s1386_s9 + $0xf8] sm:$0xff] %v698_v21  ;;  %859 = vst [vmem:[%s1386_s9 + $0x1f8] sm:$0x7f] %v794_v55 }
 0x130 PF: > { %s13_s14 = sadd.s32 1, %s1054_s14   ;;  %s1489_s12 = smov %s1050_s13 }
 0x131   : > { %p10_p5 = scmp.ge.s32.totalorder %s13_s14, 4   ;;  %s1490_s13 = smov %s1492_s15 }
 0x133   :  { %12 = sbr.rel (!%p10_p5) target bundleno = 2 (0x2), region = 62 }

</bundles_post_ra>
